<compile_context>
chip_gen: v7x
topology: tpu7x:2x2x1
jax: 0.10.0
libtpu: 0.0.40
codegen_flags: <defaults>
</compile_context>

<pallas_src>
import math

import jax
import jax.numpy as jnp
from jax.experimental import pallas as pl
from jax.experimental.pallas import tpu as pltpu


_SQRT_2_OVER_PI = 0.7978845608028654
_LN_EPS = 1e-5

_VMEM_LIMIT_BYTES = 48 * 1024 * 1024      # above 16/32 MiB defaults, under v7x 64 MiB/TC
_VMEM_TILE_BUDGET = 36 * 1024 * 1024      # budget used when picking the token tile


def _block_kernel(x_ref, g_ref, b_ref, w1_ref, b1_ref, w2_ref, b2_ref, o_ref):
    # x_ref: (tm, E) token tile (f32). w1_ref/w2_ref: bf16, fully VMEM-resident.
    x = x_ref[...].astype(jnp.float32)

    # --- LayerNorm over E (eps=1e-5, biased variance, matches nn.LayerNorm) ---
    mean = jnp.mean(x, axis=-1, keepdims=True)
    xc = x - mean
    var = jnp.mean(xc * xc, axis=-1, keepdims=True)
    xn = xc * jax.lax.rsqrt(var + _LN_EPS)
    xn = xn * g_ref[...] + b_ref[...]                                  # (tm, E) f32

    # --- Linear(E -> 4E): single-pass bf16 MXU matmul, f32 accumulation ---
    h = jnp.dot(xn.astype(jnp.bfloat16), w1_ref[...],
                preferred_element_type=jnp.float32)
    h = h + b1_ref[...]

    # TODO(synk): nn.GELU() default is the exact erf form; the tanh
    # approximation is used for guaranteed Mosaic lowering (max abs diff ~3e-3).
    h = 0.5 * h * (1.0 + jnp.tanh(_SQRT_2_OVER_PI * (h + 0.044715 * h * h * h)))

    # --- Linear(4E -> E): single-pass bf16 MXU matmul, f32 accumulation ---
    y = jnp.dot(h.astype(jnp.bfloat16), w2_ref[...],
                preferred_element_type=jnp.float32)
    y = y + b2_ref[...]

    # TODO(synk): nn.Dropout(resid_pdrop) is identity at inference; a training
    # port would use pltpu.prng_seed / pltpu.prng_random_bits for the mask.
    o_ref[...] = y.astype(o_ref.dtype)


def _pick_token_tile(m, e, h):
    """Largest token tile (<=512, >=8, multiple of 8) fitting the VMEM budget."""
    weight_bytes = 2 * (e * h) + 2 * (h * e)          # bf16 W1 + W2, single-buffered
    m8 = max(8, ((m + 7) // 8) * 8)
    for t in (512, 256, 128, 64, 32, 16, 8):
        if t > m8:
            continue
        io_tiles = 4 * t * e * 4                      # x + out tiles, f32, double-buffered
        intermediate = 2 * t * h * 4                  # (t, 4E) f32 intermediate + headroom
        if weight_bytes + io_tiles + intermediate <= _VMEM_TILE_BUDGET:
            return t
    return 8


def block_forward(q, k, v, params, attn_bias=None):
    """Pallas equivalent of Block.forward: returns (mlp(ln2(q)), None)."""
    del k, v, attn_bias                               # unused by the reference module
    gamma, beta, w1, b1, w2, b2 = params
    B, T, E = q.shape
    H = w1.shape[1]                                   # 4 * E
    assert w1.shape == (E, H) and w2.shape == (H, E)

    M = B * T
    tm = _pick_token_tile(M, E, H)
    grid = (pl.cdiv(M, tm),)                          # ragged last block handled by Pallas

    x2d = q.reshape(M, E)                             # free reshape, no extra HBM pass

    # bf16 weights: halves weight HBM/VMEM bytes, enables single-pass MXU.
    w1b = w1.astype(jnp.bfloat16)
    w2b = w2.astype(jnp.bfloat16)

    # 2-D (1, N) parameter layouts: lane-dense, broadcast cleanly in-kernel.
    g2 = gamma.reshape(1, E).astype(jnp.float32)
    be2 = beta.reshape(1, E).astype(jnp.float32)
    b1_2 = b1.reshape(1, H).astype(jnp.float32)
    b2_2 = b2.reshape(1, E).astype(jnp.float32)

    cost = pl.CostEstimate(
        flops=4 * M * E * H + 8 * M * E,              # two matmuls + LN/affine
        transcendentals=M * H,                         # tanh in GELU
        bytes_accessed=(2 * M * E * 4                  # read x, write out (f32)
                        + 2 * E * H * 2                # W1 + W2 (bf16)
                        + (3 * E + H) * 4),            # gamma/beta/b1/b2
    )

    # Constant-index parameters: single-buffer (their index_map is always (0,0)).
    def _param_spec(shape):
        return pl.BlockSpec(shape, lambda i: (0, 0), pipeline_mode=pl.Buffered(1))

    out2d = pl.pallas_call(
        _block_kernel,
        out_shape=jax.ShapeDtypeStruct((M, E), q.dtype),
        grid_spec=pltpu.PrefetchScalarGridSpec(
            num_scalar_prefetch=0,
            grid=grid,
            in_specs=[
                pl.BlockSpec((tm, E), lambda i: (i, 0)),   # token tile (double-buffered)
                _param_spec((1, E)),                       # LN gamma
                _param_spec((1, E)),                       # LN beta
                _param_spec((E, H)),                       # W1 (in, out) layout, bf16
                _param_spec((1, H)),                       # b1
                _param_spec((H, E)),                       # W2 (in, out) layout, bf16
                _param_spec((1, E)),                       # b2
            ],
            out_specs=pl.BlockSpec((tm, E), lambda i: (i, 0)),
        ),
        compiler_params=pltpu.CompilerParams(
            dimension_semantics=("parallel",),
            vmem_limit_bytes=_VMEM_LIMIT_BYTES,
        ),
        cost_estimate=cost,
    )(x2d, g2, be2, w1b, b1_2, w2b, b2_2)

    x = out2d.reshape(B, T, E)
    return (x, None)


def _ref_forward(q, gamma, beta, w1, b1, w2, b2):
    """Pure-JAX reference mirroring the kernel math (bf16 matmul operands)."""
    x = q.astype(jnp.float32)
    mean = jnp.mean(x, axis=-1, keepdims=True)
    var = jnp.mean((x - mean) ** 2, axis=-1, keepdims=True)
    xn = (x - mean) * jax.lax.rsqrt(var + _LN_EPS) * gamma + beta
    h = jnp.dot(xn.astype(jnp.bfloat16), w1.astype(jnp.bfloat16),
                preferred_element_type=jnp.float32) + b1
    h = 0.5 * h * (1.0 + jnp.tanh(_SQRT_2_OVER_PI * (h + 0.044715 * h ** 3)))
    y = jnp.dot(h.astype(jnp.bfloat16), w2.astype(jnp.bfloat16),
                preferred_element_type=jnp.float32) + b2
    return y.astype(q.dtype)


if __name__ == "__main__":
    key = jax.random.PRNGKey(0)
    B, T, E = 2, 8, 128           # batch=2, seq=8, n_embd=128 (lane-aligned)
    H = 4 * E
    ks = jax.random.split(key, 9)

    q = jax.random.normal(ks[0], (B, T, E), jnp.float32)
    k = jax.random.normal(ks[1], (B, T, E), jnp.float32)   # unused by Block
    v = jax.random.normal(ks[2], (B, T, E), jnp.float32)   # unused by Block

    # Parameters generated directly in (in, out) layout (equivalent to
    # torch Linear's (out, in) weight transposed).
    gamma = 1.0 + 0.1 * jax.random.normal(ks[3], (E,), jnp.float32)
    beta = 0.1 * jax.random.normal(ks[4], (E,), jnp.float32)
    w1 = jax.random.normal(ks[5], (E, H), jnp.float32) / math.sqrt(E)
    b1 = 0.01 * jax.random.normal(ks[6], (H,), jnp.float32)
    w2 = jax.random.normal(ks[7], (H, E), jnp.float32) / math.sqrt(H)
    b2 = 0.01 * jax.random.normal(ks[8], (E,), jnp.float32)

    params = (gamma, beta, w1, b1, w2, b2)
    out, extra = block_forward(q, k, v, params)
    out = jax.block_until_ready(out)

    ref = _ref_forward(q, gamma, beta, w1, b1, w2, b2)
    assert out.shape == (B, T, E)
    assert out.dtype == q.dtype
    assert extra is None
    max_err = float(jnp.max(jnp.abs(out - ref)))
    assert jnp.allclose(out, ref, atol=5e-3, rtol=5e-3), max_err

    print("KERNEL_OK")
</pallas_src>

<mosaic_0001>
module attributes {stable_mosaic.version = 11 : i64} {
  func.func @_block_kernel(%arg0: i32, %arg1: memref<16x128xf32, #tpu.memory_space<vmem>>, %arg2: memref<1x128xf32, #tpu.memory_space<vmem>>, %arg3: memref<1x128xf32, #tpu.memory_space<vmem>>, %arg4: memref<128x512xbf16, #tpu.memory_space<vmem>>, %arg5: memref<1x512xf32, #tpu.memory_space<vmem>>, %arg6: memref<512x128xbf16, #tpu.memory_space<vmem>>, %arg7: memref<1x128xf32, #tpu.memory_space<vmem>>, %arg8: memref<16x128xf32, #tpu.memory_space<vmem>>) attributes {dimension_semantics = [#tpu.dimension_semantics<parallel>], iteration_bounds = array<i64: 1>, scalar_prefetch = 0 : i64, scratch_operands = 0 : i64, tpu.core_type = #tpu.core_type<tc>, window_params = [{transform_indices = @transform_0, window_bounds = array<i64: 16, 128>}, {pipeline_mode = #tpu.pipeline_mode<synchronous>, transform_indices = @transform_1, window_bounds = array<i64: 1, 128>}, {pipeline_mode = #tpu.pipeline_mode<synchronous>, transform_indices = @transform_2, window_bounds = array<i64: 1, 128>}, {pipeline_mode = #tpu.pipeline_mode<synchronous>, transform_indices = @transform_3, window_bounds = array<i64: 128, 512>}, {pipeline_mode = #tpu.pipeline_mode<synchronous>, transform_indices = @transform_4, window_bounds = array<i64: 1, 512>}, {pipeline_mode = #tpu.pipeline_mode<synchronous>, transform_indices = @transform_5, window_bounds = array<i64: 512, 128>}, {pipeline_mode = #tpu.pipeline_mode<synchronous>, transform_indices = @transform_6, window_bounds = array<i64: 1, 128>}, {transform_indices = @transform_7, window_bounds = array<i64: 16, 128>}]} {
    %c0 = arith.constant 0 : index
    %c0_0 = arith.constant 0 : index
    %0 = vector.load %arg1[%c0, %c0_0] : memref<16x128xf32, #tpu.memory_space<vmem>>, vector<16x128xf32>
    %cst = arith.constant dense<0.000000e+00> : vector<16xf32>
    %1 = vector.multi_reduction <add>, %0, %cst [1] : vector<16x128xf32> to vector<16xf32>
    %2 = vector.shape_cast %1 : vector<16xf32> to vector<16x1xf32>
    %cst_1 = arith.constant 1.280000e+02 : f32
    %3 = vector.broadcast %cst_1 : f32 to vector<16x1xf32>
    %4 = arith.divf %2, %3 : vector<16x1xf32>
    %5 = vector.broadcast %4 : vector<16x1xf32> to vector<16x128xf32>
    %6 = arith.subf %0, %5 : vector<16x128xf32>
    %7 = arith.mulf %6, %6 : vector<16x128xf32>
    %cst_2 = arith.constant dense<0.000000e+00> : vector<16xf32>
    %8 = vector.multi_reduction <add>, %7, %cst_2 [1] : vector<16x128xf32> to vector<16xf32>
    %9 = vector.shape_cast %8 : vector<16xf32> to vector<16x1xf32>
    %cst_3 = arith.constant 1.280000e+02 : f32
    %10 = vector.broadcast %cst_3 : f32 to vector<16x1xf32>
    %11 = arith.divf %9, %10 : vector<16x1xf32>
    %cst_4 = arith.constant 9.99999974E-6 : f32
    %12 = vector.broadcast %cst_4 : f32 to vector<16x1xf32>
    %13 = arith.addf %11, %12 : vector<16x1xf32>
    %14 = math.rsqrt %13 : vector<16x1xf32>
    %15 = vector.broadcast %14 : vector<16x1xf32> to vector<16x128xf32>
    %16 = arith.mulf %6, %15 : vector<16x128xf32>
    %c0_5 = arith.constant 0 : index
    %c0_6 = arith.constant 0 : index
    %17 = vector.load %arg2[%c0_5, %c0_6] : memref<1x128xf32, #tpu.memory_space<vmem>>, vector<1x128xf32>
    %18 = vector.broadcast %17 : vector<1x128xf32> to vector<16x128xf32>
    %19 = arith.mulf %16, %18 : vector<16x128xf32>
    %c0_7 = arith.constant 0 : index
    %c0_8 = arith.constant 0 : index
    %20 = vector.load %arg3[%c0_7, %c0_8] : memref<1x128xf32, #tpu.memory_space<vmem>>, vector<1x128xf32>
    %21 = vector.broadcast %20 : vector<1x128xf32> to vector<16x128xf32>
    %22 = arith.addf %19, %21 : vector<16x128xf32>
    %23 = arith.truncf %22 : vector<16x128xf32> to vector<16x128xbf16>
    %c0_9 = arith.constant 0 : index
    %c0_10 = arith.constant 0 : index
    %24 = vector.load %arg4[%c0_9, %c0_10] : memref<128x512xbf16, #tpu.memory_space<vmem>>, vector<128x512xbf16>
    %cst_11 = arith.constant dense<0.000000e+00> : vector<16x512xf32>
    %25 = tpu.matmul %23, %24, %cst_11 {dimension_numbers = #tpu.dot_dimension_numbers<[1], [0], [0], [1], [0, 0, 1, 1], [], []>} : vector<16x128xbf16>, vector<128x512xbf16>, vector<16x512xf32> -> vector<16x512xf32>
    %c0_12 = arith.constant 0 : index
    %c0_13 = arith.constant 0 : index
    %26 = vector.load %arg5[%c0_12, %c0_13] : memref<1x512xf32, #tpu.memory_space<vmem>>, vector<1x512xf32>
    %27 = vector.broadcast %26 : vector<1x512xf32> to vector<16x512xf32>
    %28 = arith.addf %25, %27 : vector<16x512xf32>
    %cst_14 = arith.constant 5.000000e-01 : f32
    %29 = vector.broadcast %cst_14 : f32 to vector<16x512xf32>
    %30 = arith.mulf %29, %28 : vector<16x512xf32>
    %cst_15 = arith.constant 4.471500e-02 : f32
    %31 = vector.broadcast %cst_15 : f32 to vector<16x512xf32>
    %32 = arith.mulf %31, %28 : vector<16x512xf32>
    %33 = arith.mulf %32, %28 : vector<16x512xf32>
    %34 = arith.mulf %33, %28 : vector<16x512xf32>
    %35 = arith.addf %28, %34 : vector<16x512xf32>
    %cst_16 = arith.constant 0.797884583 : f32
    %36 = vector.broadcast %cst_16 : f32 to vector<16x512xf32>
    %37 = arith.mulf %36, %35 : vector<16x512xf32>
    %38 = math.tanh %37 : vector<16x512xf32>
    %cst_17 = arith.constant 1.000000e+00 : f32
    %39 = vector.broadcast %cst_17 : f32 to vector<16x512xf32>
    %40 = arith.addf %39, %38 : vector<16x512xf32>
    %41 = arith.mulf %30, %40 : vector<16x512xf32>
    %42 = arith.truncf %41 : vector<16x512xf32> to vector<16x512xbf16>
    %c0_18 = arith.constant 0 : index
    %c0_19 = arith.constant 0 : index
    %43 = vector.load %arg6[%c0_18, %c0_19] : memref<512x128xbf16, #tpu.memory_space<vmem>>, vector<512x128xbf16>
    %cst_20 = arith.constant dense<0.000000e+00> : vector<16x128xf32>
    %44 = tpu.matmul %42, %43, %cst_20 {dimension_numbers = #tpu.dot_dimension_numbers<[1], [0], [0], [1], [0, 0, 1, 1], [], []>} : vector<16x512xbf16>, vector<512x128xbf16>, vector<16x128xf32> -> vector<16x128xf32>
    %c0_21 = arith.constant 0 : index
    %c0_22 = arith.constant 0 : index
    %45 = vector.load %arg7[%c0_21, %c0_22] : memref<1x128xf32, #tpu.memory_space<vmem>>, vector<1x128xf32>
    %46 = vector.broadcast %45 : vector<1x128xf32> to vector<16x128xf32>
    %47 = arith.addf %44, %46 : vector<16x128xf32>
    %c0_23 = arith.constant 0 : index
    %c0_24 = arith.constant 0 : index
    %48 = vector.load %arg8[%c0_23, %c0_24] : memref<16x128xf32, #tpu.memory_space<vmem>>, vector<16x128xf32>
    tpu.vector_store %arg8[%c0_23, %c0_24], %47 {strides = array<i32>} : memref<16x128xf32, #tpu.memory_space<vmem>>, vector<16x128xf32>,
    return
  }
  func.func @transform_0(%arg0: i32) -> (i32, i32) {
    %c0_i32 = arith.constant 0 : i32
    %c0_i32_0 = arith.constant 0 : i32
    return %arg0, %c0_i32 : i32, i32
  }
  func.func @transform_1(%arg0: i32) -> (i32, i32) {
    %c0_i32 = arith.constant 0 : i32
    %c0_i32_0 = arith.constant 0 : i32
    %c0_i32_1 = arith.constant 0 : i32
    return %c0_i32, %c0_i32_0 : i32, i32
  }
  func.func @transform_2(%arg0: i32) -> (i32, i32) {
    %c0_i32 = arith.constant 0 : i32
    %c0_i32_0 = arith.constant 0 : i32
    %c0_i32_1 = arith.constant 0 : i32
    return %c0_i32, %c0_i32_0 : i32, i32
  }
  func.func @transform_3(%arg0: i32) -> (i32, i32) {
    %c0_i32 = arith.constant 0 : i32
    %c0_i32_0 = arith.constant 0 : i32
    %c0_i32_1 = arith.constant 0 : i32
    return %c0_i32, %c0_i32_0 : i32, i32
  }
  func.func @transform_4(%arg0: i32) -> (i32, i32) {
    %c0_i32 = arith.constant 0 : i32
    %c0_i32_0 = arith.constant 0 : i32
    %c0_i32_1 = arith.constant 0 : i32
    return %c0_i32, %c0_i32_0 : i32, i32
  }
  func.func @transform_5(%arg0: i32) -> (i32, i32) {
    %c0_i32 = arith.constant 0 : i32
    %c0_i32_0 = arith.constant 0 : i32
    %c0_i32_1 = arith.constant 0 : i32
    return %c0_i32, %c0_i32_0 : i32, i32
  }
  func.func @transform_6(%arg0: i32) -> (i32, i32) {
    %c0_i32 = arith.constant 0 : i32
    %c0_i32_0 = arith.constant 0 : i32
    %c0_i32_1 = arith.constant 0 : i32
    return %c0_i32, %c0_i32_0 : i32, i32
  }
  func.func @transform_7(%arg0: i32) -> (i32, i32) {
    %c0_i32 = arith.constant 0 : i32
    %c0_i32_0 = arith.constant 0 : i32
    return %arg0, %c0_i32 : i32, i32
  }
}

</mosaic_0001>

<bundles_post_ra>
// kernel: tpu_custom_call.1
= control target key start
LH: loop header
LB: loop body
LE: loop exit
PB: predicated region body
PF: predicated region fallthrough
CT: control target
= control target key end

     0   :  { %12 = vsyncpa [#allocation3], 0  ;;  %s1339_s0 = inlined_call_operand.hbm [shape: f32[16,128], index: 0, kind: input, shape index: {}]   ;;  %s1340_s1 = inlined_call_operand.vmem [shape: f32[1,128], index: 1, kind: input, shape index: {}]   ;;  %s1341_s2 = inlined_call_operand.vmem [shape: f32[1,128], index: 2, kind: input, shape index: {}]   ;;  %s1342_s3 = inlined_call_operand.hbm [shape: bf16[128,512], index: 3, kind: input, shape index: {}]   ;;  %s1343_s4 = inlined_call_operand.vmem [shape: f32[1,512], index: 4, kind: input, shape index: {}]   ;;  %s1344_s5 = inlined_call_operand.hbm [shape: bf16[512,128], index: 5, kind: input, shape index: {}]   ;;  %s1345_s6 = inlined_call_operand.vmem [shape: f32[1,128], index: 6, kind: input, shape index: {}]   ;;  %s1346_s7 = inlined_call_operand.hbm [shape: f32[16,128], index: 7, kind: output, shape index: {}]  }
   0x1   :  { %13 = vsyncpa [#allocation6], 0 }
   0x2   :  { %14 = vsyncpa [#allocation4], 0  ;;  %s1170_s24 = smov [#allocation5]   ;;  %s1076_s28 = scalar_lea.hbm %s1342_s3, 4096 }
   0x3   :  { %s36_s25 = sshll.u32 %s1170_s24, 4  ;;  %p1077_p0 = scmp.ne.s32.totalorder %s1342_s3, %s1076_s28  ;;  %s37_s25 = int_to_ptr.vmem [resolvable:$true] %s36_s25 }
   0x4   :  { %p1080_p1 = scmp.lt.u32.totalorder %s1076_s28, %s1342_s3 }
   0x6   :  { %p1082_p2 = pnand %p1080_p1, %p1077_p0 }
   0x8   :  { %1085 = shalt.err (!%p1082_p2)
}
   0x9   :  { %s1086_s10 = scalar_lea.vmem %s37_s25, 4096  ;;  %p1091_p4 = scmp.lt.s32.totalorder %s37_s25, %s37_s25 }
   0xa   :  { %p1087_p3 = scmp.ne.s32.totalorder %s37_s25, %s1086_s10  ;;  %p1092_p5 = scmp.lt.s32.totalorder %s1086_s10, %s1086_s10 }
   0xc   :  { %p1093_p6 = por %p1092_p5, %p1091_p4 }
   0xe   :  { %p1094_p7 = pnand %p1093_p6, %p1087_p3 }
  0x10   :  { %1097 = shalt.err (!%p1094_p7)
}
  0x11   :  { %s1171_s11 = smov 256   ;;  %s1172_s12 = smov 16  }
  0x12   :  { %42 = dma.hbm_to_vmem [thread:$0]  %s1342_s3, 4096, %s37_s25, [#allocation6], %s1171_s11, %s1171_s11, %s1172_s12  }
  0x13   :  { %s1173_s15 = smov [#allocation2]   ;;  %s1098_s19 = scalar_lea.hbm %s1339_s0, 256 }
  0x14   :  { %s20_s16 = sshll.u32 %s1173_s15, 4  ;;  %p1099_p8 = scmp.ne.s32.totalorder %s1339_s0, %s1098_s19  ;;  %s21_s16 = int_to_ptr.vmem [resolvable:$true] %s20_s16 }
  0x15   :  { %p1102_p9 = scmp.lt.u32.totalorder %s1098_s19, %s1339_s0 }
  0x17   :  { %p1104_p10 = pnand %p1102_p9, %p1099_p8 }
  0x19   :  { %1107 = shalt.err (!%p1104_p10)
}
  0x1a   :  { %s1108_s24 = scalar_lea.vmem %s21_s16, 256  ;;  %p1113_p12 = scmp.lt.s32.totalorder %s21_s16, %s21_s16 }
  0x1b   :  { %p1109_p11 = scmp.ne.s32.totalorder %s21_s16, %s1108_s24  ;;  %p1114_p13 = scmp.lt.s32.totalorder %s1108_s24, %s1108_s24 }
  0x1d   :  { %p1115_p0 = por %p1114_p13, %p1113_p12 }
  0x1f   :  { %p1116_p1 = pnand %p1115_p0, %p1109_p11 }
  0x21   :  { %1119 = shalt.err (!%p1116_p1)
}
  0x22   :  { %s1174_s3 = smov 128   ;;  %s1175_s25 = smov 8  }
  0x23   :  { %26 = dma.hbm_to_vmem [thread:$0]  %s1339_s0, 256, %s21_s16, [#allocation3], %s1174_s3, %s1174_s3, %s1175_s25  }
  0x24   :  { %s1176_s28 = smov [#allocation7]   ;;  %s1120_s9 = scalar_lea.hbm %s1344_s5, 4096 }
  0x25   :  { %s50_s29 = sshll.u32 %s1176_s28, 4  ;;  %p1121_p2 = scmp.ne.s32.totalorder %s1344_s5, %s1120_s9  ;;  %s51_s29 = int_to_ptr.vmem [resolvable:$true] %s50_s29 }
  0x26   :  { %p1124_p3 = scmp.lt.u32.totalorder %s1120_s9, %s1344_s5 }
  0x28   :  { %p1126_p4 = pnand %p1124_p3, %p1121_p2 }
  0x2a   :  { %1129 = shalt.err (!%p1126_p4)
}
  0x2b   :  { %s1130_s14 = scalar_lea.vmem %s51_s29, 4096  ;;  %p1135_p6 = scmp.lt.s32.totalorder %s51_s29, %s51_s29 }
  0x2c   :  { %p1131_p5 = scmp.ne.s32.totalorder %s51_s29, %s1130_s14  ;;  %p1136_p7 = scmp.lt.s32.totalorder %s1130_s14, %s1130_s14 }
  0x2e   :  { %p1137_p8 = por %p1136_p7, %p1135_p6 }
  0x30   :  { %p1138_p9 = pnand %p1137_p8, %p1131_p5 }
  0x32   :  { %1141 = shalt.err (!%p1138_p9)
}
  0x33   :  { %s1177_s0 = smov 64   ;;  %s1178_s15 = smov 4  }
  0x34   :  { %56 = dma.hbm_to_vmem [thread:$0]  %s1344_s5, 4096, %s51_s29, [#allocation6], %s1177_s0, %s1177_s0, %s1178_s15  }
  0x35   :  { %1164 = dma.done.wait [#allocation3], 256  }
  0x36   :  { %1165 = vsyncadd [#allocation3], 4294967040 }
  0x37   :  { %1166 = dma.done.wait [#allocation6], 8192  }
  0x38   :  { %1167 = vsyncadd [#allocation6], 4294959104  ;;  %v69_v0 = vld [vmem:[#allocation2] sm:$0xff]  ;;  %v70_v1 = vld [vmem:[#allocation2 + $0x8] sm:$0xff]  ;;  %v1179_v36 = vmov 0   ;;  %s1180_s22 = smov [#allocation8]  }
  0x39   :  { %71 = vadd.xlane.f32.xlu0 %v69_v0  ;;  %v976_v2 = vld [vmem:[#allocation5 + $0x4] ss:$16 sps:$4 sm:$0xff]   ;;  %v978_v3 = vld [vmem:[#allocation5 + $0xc] ss:$16 sps:$4 sm:$0xff]   ;;  %v980_v4 = vld [vmem:[#allocation5] ss:$16 sps:$4 sm:$0xff]   ;;  %359 = vmatprep.mubr.bf16.mxu0 %v1179_v36 }
  0x3a   :  { %v981_v5 = vld [vmem:[#allocation5 + $0x8] ss:$16 sps:$4 sm:$0xff]   ;;  %v982_v6 = vld [vmem:[#allocation5 + $0x24] ss:$16 sps:$4 sm:$0xff]   ;;  %v984_v7 = vld [vmem:[#allocation5 + $0x2c] ss:$16 sps:$4 sm:$0xff]   ;;  %327 = vmatprep.subr.bf16.mxu0 %v976_v2  ;;  %370 = vmatprep.subr.bf16.mxu1 %v978_v3 }
  0x3b   :  { %328 = vmatpush1.bf16.msra.mxu0 %v980_v4  ;;  %371 = vmatpush1.bf16.msra.mxu1 %v981_v5  ;;  %v986_v16 = vld [vmem:[#allocation5 + $0x20] ss:$16 sps:$4 sm:$0xff]   ;;  %v987_v17 = vld [vmem:[#allocation5 + $0x28] ss:$16 sps:$4 sm:$0xff]   ;;  %v988_v18 = vld [vmem:[#allocation5 + $0x44] ss:$16 sps:$4 sm:$0xff]  }
  0x3c   :  { %329 = vmatprep.subr.bf16.mxu0 %v982_v6  ;;  %372 = vmatprep.subr.bf16.mxu1 %v984_v7  ;;  %v990_v19 = vld [vmem:[#allocation5 + $0x4c] ss:$16 sps:$4 sm:$0xff]   ;;  %v992_v20 = vld [vmem:[#allocation5 + $0x40] ss:$16 sps:$4 sm:$0xff]   ;;  %v993_v21 = vld [vmem:[#allocation5 + $0x48] ss:$16 sps:$4 sm:$0xff]  }
  0x3d   :  { %73 = vadd.xlane.f32.xlu0 %v70_v1  ;;  %v994_v22 = vld [vmem:[#allocation5 + $0x64] ss:$16 sps:$4 sm:$0xff]   ;;  %v996_v23 = vld [vmem:[#allocation5 + $0x6c] ss:$16 sps:$4 sm:$0xff]   ;;  %v998_v24 = vld [vmem:[#allocation5 + $0x60] ss:$16 sps:$4 sm:$0xff]   ;;  %402 = vmatprep.mubr.bf16.mxu1 %v1179_v36 }
  0x3e   :  { %v999_v25 = vld [vmem:[#allocation5 + $0x68] ss:$16 sps:$4 sm:$0xff]   ;;  %v1000_v26 = vld [vmem:[#allocation5 + $0x84] ss:$16 sps:$4 sm:$0xff]   ;;  %v1002_v27 = vld [vmem:[#allocation5 + $0x8c] ss:$16 sps:$4 sm:$0xff]  }
  0x3f   :  { %330 = vmatpush1.bf16.msra.mxu0 %v986_v16  ;;  %373 = vmatpush1.bf16.msra.mxu1 %v987_v17  ;;  %v1004_v28 = vld [vmem:[#allocation5 + $0x80] ss:$16 sps:$4 sm:$0xff]   ;;  %v1005_v29 = vld [vmem:[#allocation5 + $0x88] ss:$16 sps:$4 sm:$0xff]   ;;  %v1006_v30 = vld [vmem:[#allocation5 + $0xa4] ss:$16 sps:$4 sm:$0xff]  }
  0x40   :  { %331 = vmatprep.subr.bf16.mxu0 %v988_v18  ;;  %374 = vmatprep.subr.bf16.mxu1 %v990_v19  ;;  %v1008_v31 = vld [vmem:[#allocation5 + $0xac] ss:$16 sps:$4 sm:$0xff]   ;;  %v1010_v32 = vld [vmem:[#allocation5 + $0xa0] ss:$16 sps:$4 sm:$0xff]   ;;  %v1011_v33 = vld [vmem:[#allocation5 + $0xa8] ss:$16 sps:$4 sm:$0xff]  }
  0x41   :  { %v1012_v34 = vld [vmem:[#allocation5 + $0xc4] ss:$16 sps:$4 sm:$0xff]   ;;  %v1014_v35 = vld [vmem:[#allocation5 + $0xcc] ss:$16 sps:$4 sm:$0xff]   ;;  %v1016_v37 = vld [vmem:[#allocation5 + $0xc0] ss:$16 sps:$4 sm:$0xff]  }
  0x42   :  { %v1017_v38 = vld [vmem:[#allocation5 + $0xc8] ss:$16 sps:$4 sm:$0xff]   ;;  %v1018_v39 = vld [vmem:[#allocation5 + $0xe4] ss:$16 sps:$4 sm:$0xff]   ;;  %v1020_v40 = vld [vmem:[#allocation5 + $0xec] ss:$16 sps:$4 sm:$0xff]  }
  0x43   :  { %332 = vmatpush1.bf16.msra.mxu0 %v992_v20  ;;  %375 = vmatpush1.bf16.msra.mxu1 %v993_v21  ;;  %v1022_v41 = vld [vmem:[#allocation5 + $0xe0] ss:$16 sps:$4 sm:$0xff]   ;;  %v1023_v42 = vld [vmem:[#allocation5 + $0xe8] ss:$16 sps:$4 sm:$0xff]   ;;  %s841_s23 = sshll.u32 %s1180_s22, 4  ;;  %s842_s23 = int_to_ptr.vmem [resolvable:$true] %s841_s23 }
  0x44   :  { %333 = vmatprep.subr.bf16.mxu0 %v994_v22  ;;  %376 = vmatprep.subr.bf16.mxu1 %v996_v23  ;;  %v854_v51 = vld [vmem:[%s1340_s1] ss:$0 sm:$0xff]  ;;  %v1024_v60 = vld [vmem:[#allocation7 + $0x40] sm:$0xff]   ;;  %v1030_v2 = vld [vmem:[#allocation7 + $0x8] sm:$0xff]   ;;  %p1147_p11 = scmp.lt.s32.totalorder %s842_s23, %s842_s23 }
  0x45   :  { %v855_v55 = vld [vmem:[%s1341_s2] ss:$0 sm:$0xff]  ;;  %v1025_v61 = vld [vmem:[#allocation7 + $0xc0] sm:$0xff]   ;;  %v1031_v3 = vld [vmem:[#allocation7 + $0x88] sm:$0xff]  }
  0x46   :  { %v1026_v62 = vld [vmem:[#allocation7] sm:$0xff]   ;;  %v1032_v4 = vld [vmem:[#allocation7 + $0x50] sm:$0xff]   ;;  %v1044_v16 = vld [vmem:[#allocation7 + $0x68] sm:$0xff]  }
  0x47   :  { %334 = vmatpush1.bf16.msra.mxu0 %v998_v24  ;;  %377 = vmatpush1.bf16.msra.mxu1 %v999_v25  ;;  %v1027_v63 = vld [vmem:[#allocation7 + $0x80] sm:$0xff]   ;;  %v1033_v5 = vld [vmem:[#allocation7 + $0xd0] sm:$0xff]   ;;  %v1045_v17 = vld [vmem:[#allocation7 + $0xe8] sm:$0xff]  }
  0x48   :  { %335 = vmatprep.subr.bf16.mxu0 %v1000_v26  ;;  %378 = vmatprep.subr.bf16.mxu1 %v1002_v27  ;;  %v1034_v6 = vld [vmem:[#allocation7 + $0x10] sm:$0xff]   ;;  %v1046_v18 = vld [vmem:[#allocation7 + $0x28] sm:$0xff]   ;;  %v1052_v24 = vld [vmem:[#allocation7 + $0x78] sm:$0xff]  }
  0x49   :  { %v1035_v7 = vld [vmem:[#allocation7 + $0x90] sm:$0xff]   ;;  %v1047_v19 = vld [vmem:[#allocation7 + $0xa8] sm:$0xff]   ;;  %v1053_v25 = vld [vmem:[#allocation7 + $0xf8] sm:$0xff]  }
  0x4a   :  { %v1048_v20 = vld [vmem:[#allocation7 + $0x70] sm:$0xff]   ;;  %v1054_v26 = vld [vmem:[#allocation7 + $0x38] sm:$0xff]  }
  0x4b   :  { %336 = vmatpush1.bf16.msra.mxu0 %v1004_v28  ;;  %379 = vmatpush1.bf16.msra.mxu1 %v1005_v29  ;;  %v1049_v21 = vld [vmem:[#allocation7 + $0xf0] sm:$0xff]   ;;  %v1055_v27 = vld [vmem:[#allocation7 + $0xb8] sm:$0xff]   ;;  %v147_v28 = vlaneseq }
  0x4c   :  { %337 = vmatprep.subr.bf16.mxu0 %v1006_v30  ;;  %380 = vmatprep.subr.bf16.mxu1 %v1008_v31  ;;  %v1050_v22 = vld [vmem:[#allocation7 + $0x30] sm:$0xff]  }
  0x4d   :  { %v1051_v23 = vld [vmem:[#allocation7 + $0xb0] sm:$0xff]   ;;  %v148_v29 = vshrl.u32 %v147_v28, 7 }
  0x4f   :  { %338 = vmatpush1.bf16.msra.mxu0 %v1010_v32  ;;  %381 = vmatpush1.bf16.msra.mxu1 %v1011_v33  ;;  %v149_v30 = vsub.s32 0, %v148_v29  ;;  %v157_v31 = vsub.s32 2, %v148_v29  ;;  %v145_v32 = vld [vmem:[%s1343_s4] sm:$0xf]  ;;  %v153_v33 = vsub.s32 1, %v148_v29 }
  0x50   :  { %339 = vmatprep.subr.bf16.mxu0 %v1012_v34  ;;  %382 = vmatprep.subr.bf16.mxu1 %v1014_v35  ;;  %v161_v34 = vsub.s32 3, %v148_v29 }
  0x51   :  { %v150_v35 = vrot.slane %v145_v32, %v149_v30  ;;  %v158_v36 = vrot.slane %v145_v32, %v157_v31 }
  0x53   :  { %340 = vmatpush1.bf16.msra.mxu0 %v1016_v37  ;;  %383 = vmatpush1.bf16.msra.mxu1 %v1017_v38  ;;  %v154_v37 = vrot.slane %v145_v32, %v153_v33  ;;  %v162_v38 = vrot.slane %v145_v32, %v161_v34 }
  0x54   :  { %341 = vmatprep.subr.bf16.mxu0 %v1018_v39  ;;  %384 = vmatprep.subr.bf16.mxu1 %v1020_v40 }
  0x57   :  { %342 = vmatpush1.bf16.msra.mxu0 %v1022_v41  ;;  %385 = vmatpush1.bf16.msra.mxu1 %v1023_v42 }
  0x58   :  { %921 = vmatprep.subr.bf16.mxu0 %v1024_v60  ;;  %943 = vmatprep.subr.bf16.mxu1 %v1025_v61 }
  0xc6   :  { %v72_v8 = vpop.xlane.xlu0 %71 }
  0xc7   :  { %v76_v9 = vmul.f32 0.0078125, %v72_v8  ;;  %v1036_v8 = vld [vmem:[#allocation7 + $0x58] sm:$0xff]  }
  0xc9   :  { %v1260_v10 = vsub.f32 %v69_v0, %v76_v9  ;;  %v1028_v0 = vld [vmem:[#allocation7 + $0x48] sm:$0xff]   ;;  %v1037_v9 = vld [vmem:[#allocation7 + $0xd8] sm:$0xff]  }
  0xca   :  { %v74_v11 = vpop.xlane.xlu0 %73 }
  0xcb   :  { %v77_v12 = vmul.f32 0.0078125, %v74_v11  ;;  %v80_v13 = vmul.f32 %v1260_v10, %v1260_v10  ;;  %v1039_v11 = vld [vmem:[#allocation7 + $0x98] sm:$0xff]  }
  0xcd   :  { %v1264_v14 = vsub.f32 %v70_v1, %v77_v12  ;;  %82 = vadd.xlane.f32.xlu1 %v80_v13  ;;  %v1029_v1 = vld [vmem:[#allocation7 + $0xc8] sm:$0xff]   ;;  %v1040_v12 = vld [vmem:[#allocation7 + $0x60] sm:$0xff]  }
  0xce   :  { %v1041_v13 = vld [vmem:[#allocation7 + $0xe0] sm:$0xff]  }
  0xcf   :  { %v81_v15 = vmul.f32 %v1264_v14, %v1264_v14 }
  0xd1   :  { %84 = vadd.xlane.f32.xlu1 %v81_v15  ;;  %v1043_v15 = vld [vmem:[#allocation7 + $0xa0] sm:$0xff]  }
 0x15a   :  { %v83_v43 = vpop.xlane.xlu1 %82 }
 0x15b   :  { %v86_v44 = vmul.f32 0.0078125, %v83_v43 }
 0x15d   :  { %v88_v45 = vadd.f32 1e-05, %v86_v44 }
 0x15e   :  { %v85_v46 = vpop.xlane.xlu1 %84 }
 0x15f   :  { %1056 = vrsqrt.f32 %v88_v45  ;;  %v87_v47 = vmul.f32 0.0078125, %v85_v46 }
 0x161   :  { %v89_v48 = vadd.f32 1e-05, %v87_v47 }
 0x163   :  { %1058 = vrsqrt.f32 %v89_v48 }
 0x169   :  { %v1057_v49 = vpop.eup %1056 }
 0x16a   :  { %v92_v50 = vmul.f32 %v1057_v49, %v1260_v10  ;;  %v1038_v10 = vld [vmem:[#allocation7 + $0x18] sm:$0xff]  }
 0x16c   :  { %v101_v54 = vmul.f32 %v854_v51, %v92_v50 }
 0x16d   :  { %v1059_v52 = vpop.eup %1058 }
 0x16e   :  { %v93_v53 = vmul.f32 %v1059_v52, %v1264_v14  ;;  %v110_v57 = vadd.f32 %v855_v55, %v101_v54  ;;  %v1042_v14 = vld [vmem:[#allocation7 + $0x20] sm:$0xff]  }
 0x170   :  { %v102_v56 = vmul.f32 %v854_v51, %v93_v53 }
 0x172   :  { %v111_v58 = vadd.f32 %v855_v55, %v102_v56 }
 0x174   :  { %v112_v59 = vpack.c.bf16 %v111_v58, %v110_v57 }
 0x176   :  { %360 = vmatmul.mubr.bf16.vlgmr.msra.gmra.mrb[0].mxu0 %v112_v59  ;;  %403 = vmatmul.mubr.bf16.vlgmr.msra.gmra.mrb[0].mxu1 %v112_v59 }
 0x177   :  { %922 = vmatpush3.bf16.msra.mxu0 %v1026_v62  ;;  %944 = vmatpush3.bf16.msra.mxu1 %v1027_v63 }
 0x178   :  { %923 = vmatprep.subr.bf16.mxu0 %v1028_v0  ;;  %945 = vmatprep.subr.bf16.mxu1 %v1029_v1 }
 0x17b   :  { %924 = vmatpush3.bf16.msra.mxu0 %v1030_v2  ;;  %946 = vmatpush3.bf16.msra.mxu1 %v1031_v3 }
 0x17c   :  { %925 = vmatprep.subr.bf16.mxu0 %v1032_v4  ;;  %947 = vmatprep.subr.bf16.mxu1 %v1033_v5 }
 0x17f   :  { %926 = vmatpush3.bf16.msra.mxu0 %v1034_v6  ;;  %948 = vmatpush3.bf16.msra.mxu1 %v1035_v7 }
 0x180   :  { %927 = vmatprep.subr.bf16.mxu0 %v1036_v8  ;;  %949 = vmatprep.subr.bf16.mxu1 %v1037_v9 }
 0x183   :  { %928 = vmatpush3.bf16.msra.mxu0 %v1038_v10  ;;  %950 = vmatpush3.bf16.msra.mxu1 %v1039_v11 }
 0x184   :  { %929 = vmatprep.subr.bf16.mxu0 %v1040_v12  ;;  %951 = vmatprep.subr.bf16.mxu1 %v1041_v13 }
 0x187   :  { %930 = vmatpush3.bf16.msra.mxu0 %v1042_v14  ;;  %952 = vmatpush3.bf16.msra.mxu1 %v1043_v15 }
 0x188   :  { %931 = vmatprep.subr.bf16.mxu0 %v1044_v16  ;;  %953 = vmatprep.subr.bf16.mxu1 %v1045_v17 }
 0x18b   :  { %932 = vmatpush3.bf16.msra.mxu0 %v1046_v18  ;;  %954 = vmatpush3.bf16.msra.mxu1 %v1047_v19 }
 0x18c   :  { %933 = vmatprep.subr.bf16.mxu0 %v1048_v20  ;;  %955 = vmatprep.subr.bf16.mxu1 %v1049_v21 }
 0x18f   :  { %934 = vmatpush3.bf16.msra.mxu0 %v1050_v22  ;;  %956 = vmatpush3.bf16.msra.mxu1 %v1051_v23 }
 0x190   :  { %935 = vmatprep.subr.bf16.mxu0 %v1052_v24  ;;  %957 = vmatprep.subr.bf16.mxu1 %v1053_v25 }
 0x193   :  { %936 = vmatpush3.bf16.msra.mxu0 %v1054_v26  ;;  %958 = vmatpush3.bf16.msra.mxu1 %v1055_v27 }
 0x249   :  { %v361_v39 = vpop.f32.mrb[0].mxu0  ;;  %v404_v40 = vpop.f32.mrb[0].mxu1 }
 0x24a   :  { %v1279_v41 = vadd.f32 %v361_v39, %v150_v35  ;;  %v1281_v42 = vadd.f32 %v404_v40, %v158_v36  ;;  %v363_v43 = vpop.f32.mrb[1].mxu0  ;;  %v406_v44 = vpop.f32.mrb[1].mxu1 }
 0x24b   :  { %v1283_v45 = vadd.f32 %v363_v43, %v154_v37  ;;  %v1285_v46 = vadd.f32 %v406_v44, %v162_v38  ;;  %v365_v47 = vpop.f32.mrb[2].mxu0  ;;  %v408_v48 = vpop.f32.mrb[2].mxu1 }
 0x24c   :  { %v421_v49 = vmul.f32 0.044715, %v1279_v41  ;;  %v423_v50 = vmul.f32 0.044715, %v1281_v42  ;;  %v366_v51 = vadd.f32 %v365_v47, %v150_v35  ;;  %v409_v52 = vadd.f32 %v408_v48, %v158_v36  ;;  %v367_v53 = vpop.f32.mrb[3].mxu0  ;;  %v410_v54 = vpop.f32.mrb[3].mxu1 }
 0x24d   :  { %v422_v55 = vmul.f32 0.044715, %v1283_v45  ;;  %v424_v56 = vmul.f32 0.044715, %v1285_v46  ;;  %v1291_v57 = vadd.f32 %v367_v53, %v154_v37  ;;  %v1293_v58 = vadd.f32 %v410_v54, %v162_v38 }
 0x24e   :  { %v429_v59 = vmul.f32 %v421_v49, %v1279_v41  ;;  %v431_v60 = vmul.f32 %v423_v50, %v1281_v42  ;;  %v425_v61 = vmul.f32 0.044715, %v366_v51  ;;  %v427_v62 = vmul.f32 0.044715, %v409_v52 }
 0x24f   :  { %v430_v63 = vmul.f32 %v422_v55, %v1283_v45  ;;  %v432_v0 = vmul.f32 %v424_v56, %v1285_v46  ;;  %v426_v1 = vmul.f32 0.044715, %v1291_v57  ;;  %v428_v2 = vmul.f32 0.044715, %v1293_v58 }
 0x250   :  { %v437_v3 = vmul.f32 %v429_v59, %v1279_v41  ;;  %v439_v4 = vmul.f32 %v431_v60, %v1281_v42  ;;  %v433_v5 = vmul.f32 %v425_v61, %v366_v51  ;;  %v435_v6 = vmul.f32 %v427_v62, %v409_v52 }
 0x251   :  { %v438_v7 = vmul.f32 %v430_v63, %v1283_v45  ;;  %v440_v8 = vmul.f32 %v432_v0, %v1285_v46  ;;  %v434_v9 = vmul.f32 %v426_v1, %v1291_v57  ;;  %v436_v10 = vmul.f32 %v428_v2, %v1293_v58 }
 0x252   :  { %v445_v11 = vadd.f32 %v437_v3, %v1279_v41  ;;  %v447_v12 = vadd.f32 %v439_v4, %v1281_v42  ;;  %v441_v13 = vmul.f32 %v433_v5, %v366_v51  ;;  %v443_v14 = vmul.f32 %v435_v6, %v409_v52 }
 0x253   :  { %v442_v15 = vmul.f32 %v434_v9, %v1291_v57  ;;  %v444_v16 = vmul.f32 %v436_v10, %v1293_v58  ;;  %v446_v21 = vadd.f32 %v438_v7, %v1283_v45  ;;  %v448_v25 = vadd.f32 %v440_v8, %v1285_v46 }
 0x254   :  { %v453_v17 = vmul.f32 0.7978846, %v445_v11  ;;  %v455_v18 = vmul.f32 0.7978846, %v447_v12  ;;  %v449_v19 = vadd.f32 %v441_v13, %v366_v51  ;;  %v451_v20 = vadd.f32 %v443_v14, %v409_v52 }
 0x255   :  { %v450_v22 = vadd.f32 %v442_v15, %v1291_v57  ;;  %v454_v26 = vmul.f32 0.7978846, %v446_v21  ;;  %v452_v28 = vadd.f32 %v444_v16, %v1293_v58  ;;  %v456_v29 = vmul.f32 0.7978846, %v448_v25 }
 0x256   :  { %1060 = vtanh.f32 %v453_v17  ;;  %v457_v23 = vmul.f32 0.7978846, %v449_v19  ;;  %v459_v24 = vmul.f32 0.7978846, %v451_v20  ;;  %v413_v37 = vmul.f32 0.5, %v1279_v41 }
 0x257   :  { %1062 = vtanh.f32 %v455_v18  ;;  %v458_v27 = vmul.f32 0.7978846, %v450_v22  ;;  %v460_v30 = vmul.f32 0.7978846, %v452_v28  ;;  %v417_v38 = vmul.f32 0.5, %v366_v51 }
 0x258   :  { %1064 = vtanh.f32 %v457_v23  ;;  %v415_v43 = vmul.f32 0.5, %v1281_v42  ;;  %v419_v44 = vmul.f32 0.5, %v409_v52  ;;  %v414_v49 = vmul.f32 0.5, %v1283_v45 }
 0x259   :  { %1066 = vtanh.f32 %v459_v24  ;;  %v418_v56 = vmul.f32 0.5, %v1291_v57  ;;  %v416_v51 = vmul.f32 0.5, %v1285_v46  ;;  %v420_v62 = vmul.f32 0.5, %v1293_v58  ;;  %v888_v46 = vld [vmem:[%s1345_s6] ss:$0 sm:$0xff]  ;;  %s1142_s6 = scalar_lea.vmem %s842_s23, 256 }
 0x25a   :  { %1068 = vtanh.f32 %v454_v26  ;;  %p1143_p10 = scmp.ne.s32.totalorder %s842_s23, %s1142_s6  ;;  %p1148_p12 = scmp.lt.s32.totalorder %s1142_s6, %s1142_s6 }
 0x25b   :  { %1070 = vtanh.f32 %v458_v27 }
 0x25c   :  { %1072 = vtanh.f32 %v456_v29  ;;  %p1149_p13 = por %p1148_p12, %p1147_p11 }
 0x25d   :  { %1074 = vtanh.f32 %v460_v30 }
 0x25e   :  { %p1150_p0 = pnand %p1149_p13, %p1143_p10 }
 0x260   :  { %v1061_v31 = vpop.eup %1060 }
 0x261   :  { %v1063_v32 = vpop.eup %1062  ;;  %v469_v33 = vadd.f32 1.0, %v1061_v31 }
 0x262   :  { %v1065_v34 = vpop.eup %1064  ;;  %v471_v35 = vadd.f32 1.0, %v1063_v32 }
 0x263   :  { %v1067_v36 = vpop.eup %1066  ;;  %v473_v39 = vadd.f32 1.0, %v1065_v34  ;;  %v477_v53 = vmul.f32 %v469_v33, %v413_v37 }
 0x264   :  { %v1069_v40 = vpop.eup %1068  ;;  %v475_v47 = vadd.f32 1.0, %v1067_v36  ;;  %v479_v60 = vmul.f32 %v471_v35, %v415_v43 }
 0x265   :  { %v1071_v48 = vpop.eup %1070  ;;  %v470_v50 = vadd.f32 1.0, %v1069_v40  ;;  %v481_v54 = vmul.f32 %v473_v39, %v417_v38 }
 0x266   :  { %v1073_v55 = vpop.eup %1072  ;;  %v474_v59 = vadd.f32 1.0, %v1071_v48  ;;  %v483_v61 = vmul.f32 %v475_v47, %v419_v44 }
 0x267   :  { %v1075_v41 = vpop.eup %1074  ;;  %v472_v42 = vadd.f32 1.0, %v1073_v55  ;;  %v485_v52 = vpack.c.bf16 %v481_v54, %v477_v53  ;;  %v478_v63 = vmul.f32 %v470_v50, %v414_v49 }
 0x268   :  { %v482_v0 = vmul.f32 %v474_v59, %v418_v56  ;;  %v476_v1 = vadd.f32 1.0, %v1075_v41  ;;  %v487_v45 = vpack.c.bf16 %v483_v61, %v479_v60 }
 0x269   :  { %v480_v3 = vmul.f32 %v472_v42, %v416_v51 }
 0x26a   :  { %v486_v2 = vpack.c.bf16 %v482_v0, %v478_v63  ;;  %v484_v4 = vmul.f32 %v476_v1, %v420_v62 }
 0x26c   :  { %784 = vmatprep.mubr.bf16.mxu0 %v486_v2  ;;  %v488_v5 = vpack.c.bf16 %v484_v4, %v480_v3 }
 0x26d   :  { %785 = vmatmul.mubr.bf16.vlgmr.msra.gmra.mrb[4].mxu0 %v485_v52 }
 0x26e   :  { %825 = vmatprep.mubr.bf16.mxu1 %v488_v5 }
 0x26f   :  { %826 = vmatmul.mubr.bf16.vlgmr.msra.gmra.mrb[4].mxu1 %v487_v45 }
 0x340   :  { %v937_v57 = vpop.f32.mrb[4].mxu0 }
 0x341   :  { %v938_v58 = vpop.f32.mrb[5].mxu0 }
 0x342   :  { %v959_v6 = vpop.f32.mrb[4].mxu1  ;;  %v939_v7 = vadd.f32 %v938_v58, %v937_v57  ;;  %v940_v8 = vpop.f32.mrb[6].mxu0 }
 0x343   :  { %v960_v9 = vpop.f32.mrb[5].mxu1  ;;  %v941_v10 = vpop.f32.mrb[7].mxu0 }
 0x344   :  { %v787_v11 = vadd.f32 %v939_v7, %v888_v46  ;;  %v961_v12 = vadd.f32 %v960_v9, %v959_v6  ;;  %v962_v13 = vpop.f32.mrb[6].mxu1  ;;  %v942_v14 = vadd.f32 %v941_v10, %v940_v8 }
 0x345   :  { %v963_v15 = vpop.f32.mrb[7].mxu1 }
 0x346   :  { %v828_v16 = vadd.f32 %v961_v12, %v787_v11  ;;  %v790_v17 = vadd.f32 %v942_v14, %v888_v46  ;;  %v964_v18 = vadd.f32 %v963_v15, %v962_v13 }
 0x348   :  { %834 = vst [vmem:[#allocation8] sm:$0xff] %v828_v16  ;;  %v831_v19 = vadd.f32 %v964_v18, %v790_v17 }
 0x34a   :  { %835 = vst [vmem:[#allocation8 + $0x8] sm:$0xff] %v831_v19 }
 0x34b   :  { %1153 = shalt.err (!%p1150_p0)
}
 0x34c   :  { %s1154_s27 = scalar_lea.hbm %s1346_s7, 256 }
 0x34d   :  { %p1155_p1 = scmp.ne.s32.totalorder %s1346_s7, %s1154_s27  ;;  %p1158_p2 = scmp.lt.u32.totalorder %s1154_s27, %s1346_s7 }
 0x34f   :  { %p1160_p3 = pnand %p1158_p2, %p1155_p1 }
 0x351   :  { %1163 = shalt.err (!%p1160_p3)
}
 0x352   :  { %847 = dma.vmem_to_hbm [thread:$0]  %s842_s23, 256, %s1346_s7, [#allocation4], %s1174_s3, %s1174_s3, %s1175_s25  }
 0x353   :  { %1168 = dma.done.wait [#allocation4], 256  }
 0x354   :  { %1169 = vsyncadd [#allocation4], 4294967040 }
 0x355   :  { %851 = vsyncpa [#allocation3], 1 }
 0x356   :  { %852 = vsyncpa [#allocation6], 1 }
 0x357   :  { %853 = vsyncpa [#allocation4], 1 }

</bundles_post_ra>
